<compile_context>
chip_gen: v7x
topology: tpu7x:2x2x1
jax: 0.10.0
libtpu: 0.0.40
codegen_flags: <defaults>
</compile_context>

<pallas_src>
import functools

import jax
import jax.numpy as jnp
from jax.experimental import pallas as pl
from jax.experimental.pallas import tpu as pltpu


def _l2_normalize(v):
    # Matches torch.nn.functional.normalize(v, dim=-1, eps=1e-12).
    norm = jnp.sqrt(jnp.sum(v * v, axis=-1, keepdims=True))
    return v / jnp.maximum(norm, 1e-12)


def _normalize_kernel(zx_ref, zy_ref, xn_ref, yn_ref):
    # One-time L2 normalization of both halves; bf16 outputs feed the MXU matmuls.
    xn_ref[...] = _l2_normalize(zx_ref[...].astype(jnp.float32)).astype(jnp.bfloat16)
    yn_ref[...] = _l2_normalize(zy_ref[...].astype(jnp.float32)).astype(jnp.bfloat16)


# TODO(synk): add column tiling + online (flash-style) logsumexp if T*N*4B of sim slab
# ever exceeds the VMEM budget (only relevant for extremely large batch sizes).
def _ntxent_tile_kernel(qx_ref, qy_ref, zxn_ref, zyn_ref, out_ref, *,
                        batch_size, row_tile, temperature):
    B = batch_size
    T = row_tile
    inv_t = jnp.float32(1.0 / temperature)
    row0 = pl.program_id(0) * T

    # Normalize only this step's raw row tiles in f32 (cheap, O(T*D)).
    qxn = _l2_normalize(qx_ref[...].astype(jnp.float32))
    qyn = _l2_normalize(qy_ref[...].astype(jnp.float32))

    # Positives: sim[i, i+B] = sim[i+B, i] = <zx_n[i], zy_n[i]> / temperature  (f32).
    pos = jnp.sum(qxn * qyn, axis=-1, keepdims=True) * inv_t          # (T, 1)

    # MXU operands: rows pre-scaled by 1/temperature, bf16; columns are the resident
    # bf16 normalized halves. Contract last dims of both -> no transpose materialized.
    lx = (qxn * inv_t).astype(jnp.bfloat16)                           # (T, D)
    ly = (qyn * inv_t).astype(jnp.bfloat16)                           # (T, D)
    cx = zxn_ref[...]                                                 # (B, D) bf16
    cy = zyn_ref[...]                                                 # (B, D) bf16

    dn = (((1,), (1,)), ((), ()))
    sxx = jax.lax.dot_general(lx, cx, dn, preferred_element_type=jnp.float32)  # (T, B)
    sxy = jax.lax.dot_general(lx, cy, dn, preferred_element_type=jnp.float32)
    syx = jax.lax.dot_general(ly, cx, dn, preferred_element_type=jnp.float32)
    syy = jax.lax.dot_general(ly, cy, dn, preferred_element_type=jnp.float32)

    # Mask self-similarity only: it lives on the diagonal of the xx / yy blocks.
    # Per-tile (T, B) iota — no N x N masks.
    r = jax.lax.broadcasted_iota(jnp.int32, (T, B), 0) + row0
    c = jax.lax.broadcasted_iota(jnp.int32, (T, B), 1)
    diag = r == c
    neg_big = jnp.float32(-1e30)
    sxx = jnp.where(diag, neg_big, sxx)
    syy = jnp.where(diag, neg_big, syy)

    # Row-wise logsumexp over the full row (all j != i, positives included), f32.
    def row_lse(a, b):
        m = jnp.maximum(jnp.max(a, axis=-1, keepdims=True),
                        jnp.max(b, axis=-1, keepdims=True))
        s = (jnp.sum(jnp.exp(a - m), axis=-1, keepdims=True) +
             jnp.sum(jnp.exp(b - m), axis=-1, keepdims=True))
        return m + jnp.log(s)

    lse_x = row_lse(sxx, sxy)                                         # rows of zx
    lse_y = row_lse(syx, syy)                                         # rows of zy

    # CrossEntropy(reduction='sum') with label 0 on [pos, negatives] == lse - pos.
    tile_loss = jnp.sum(lse_x - pos) + jnp.sum(lse_y - pos)
    out_ref[...] = tile_loss + jnp.zeros((1, 1, 128), jnp.float32)    # lane-dense store


def _pick_row_tile(batch_size, target=128):
    """Largest row tile <= target that divides B and respects the (8, lane) tiling."""
    if batch_size <= target:
        return batch_size                 # single full-extent tile is always legal
    for t in (128, 64, 32, 16, 8):
        if batch_size % t == 0:
            return t
    return batch_size                     # odd batch: fall back to one full tile


def ntxent_loss(zx, zy, temperature=0.5):
    """Pallas NT-Xent loss. zx, zy: (B, D) projection outputs."""
    assert zx.ndim == 2 and zx.shape == zy.shape
    B, D = zx.shape
    N = 2 * B
    T = _pick_row_tile(B)
    num_tiles = B // T

    zx = zx.astype(jnp.float32)
    zy = zy.astype(jnp.float32)

    # --- kernel 1: normalize both halves once, emit bf16 column operands ----------
    zxn, zyn = pl.pallas_call(
        _normalize_kernel,
        out_shape=(jax.ShapeDtypeStruct((B, D), jnp.bfloat16),
                   jax.ShapeDtypeStruct((B, D), jnp.bfloat16)),
        grid=(num_tiles,),
        in_specs=[pl.BlockSpec((T, D), lambda i: (i, 0)),
                  pl.BlockSpec((T, D), lambda i: (i, 0))],
        out_specs=[pl.BlockSpec((T, D), lambda i: (i, 0)),
                   pl.BlockSpec((T, D), lambda i: (i, 0))],
        compiler_params=pltpu.CompilerParams(dimension_semantics=("parallel",)),
    )(zx, zy)

    # --- kernel 2: row-tiled similarity + logsumexp, per-tile partial losses -------
    # VMEM budget: double-buffered raw row tiles + resident bf16 halves
    # + sim slabs / elementwise temporaries, with headroom.
    est = (2 * (2 * T * D * 4)        # qx, qy tiles, 2-deep pipeline
           + 2 * (2 * B * D * 2)      # resident bf16 normalized halves
           + 10 * (T * B * 4)         # 4 f32 sim slabs + exp/mask temporaries
           + (2 << 20))
    vmem_limit = int(min(max(est, 16 << 20), 48 << 20))

    kernel = functools.partial(_ntxent_tile_kernel, batch_size=B, row_tile=T,
                               temperature=float(temperature))
    partials = pl.pallas_call(
        kernel,
        out_shape=jax.ShapeDtypeStruct((num_tiles, 1, 128), jnp.float32),
        grid=(num_tiles,),
        in_specs=[pl.BlockSpec((T, D), lambda i: (i, 0)),     # raw zx row tile
                  pl.BlockSpec((T, D), lambda i: (i, 0)),     # raw zy row tile
                  pl.BlockSpec((B, D), lambda i: (0, 0)),     # resident zx_n (bf16)
                  pl.BlockSpec((B, D), lambda i: (0, 0))],    # resident zy_n (bf16)
        out_specs=pl.BlockSpec((1, 1, 128), lambda i: (i, 0, 0)),
        compiler_params=pltpu.CompilerParams(
            dimension_semantics=("parallel",),
            vmem_limit_bytes=vmem_limit),
    )(zx, zy, zxn, zyn)

    # Tiny final reduction (num_tiles scalars) + the /N normalization in plain JAX.
    return jnp.sum(partials[:, 0, 0]) / jnp.float32(N)


def _ntxent_reference(zx, zy, temperature):
    """Plain-JAX f32 reference reproducing the PyTorch forward."""
    B = zx.shape[0]
    N = 2 * B
    zxn = zx / jnp.maximum(jnp.linalg.norm(zx, axis=-1, keepdims=True), 1e-12)
    zyn = zy / jnp.maximum(jnp.linalg.norm(zy, axis=-1, keepdims=True), 1e-12)
    z = jnp.concatenate([zxn, zyn], axis=0)
    sim = (z @ z.T) / temperature
    pos = jnp.tile(jnp.sum(zxn * zyn, axis=-1) / temperature, 2)        # (N,)
    idx = jnp.arange(N)
    sim_masked = jnp.where(idx[:, None] == idx[None, :], -jnp.inf, sim)
    lse = jax.scipy.special.logsumexp(sim_masked, axis=1)
    # CE(reduction='sum') over [pos, negatives] with label 0, then / N.
    return jnp.sum(lse - pos) / N


if __name__ == "__main__":
    key = jax.random.PRNGKey(0)
    temperature = 0.5

    # (B, D): small single-tile case and a multi-tile case that exercises the grid.
    for B, D in [(8, 32), (256, 64)]:
        key, kx, ky = jax.random.split(key, 3)
        zx = jax.random.normal(kx, (B, D), dtype=jnp.float32)
        zy = jax.random.normal(ky, (B, D), dtype=jnp.float32)

        loss = ntxent_loss(zx, zy, temperature)
        jax.block_until_ready(loss)

        ref = _ntxent_reference(zx, zy, temperature)
        # bf16 MXU logits (f32 accumulate / logsumexp) -> ~1e-3 level agreement.
        assert jnp.allclose(loss, ref, rtol=1e-2, atol=1e-2), (B, D, loss, ref)

    print("KERNEL_OK")
</pallas_src>

<mosaic_0001>
module attributes {stable_mosaic.version = 11 : i64} {
  func.func @_normalize_kernel(%arg0: i32, %arg1: memref<8x32xf32, #tpu.memory_space<vmem>>, %arg2: memref<8x32xf32, #tpu.memory_space<vmem>>, %arg3: memref<8x32xbf16, #tpu.memory_space<vmem>>, %arg4: memref<8x32xbf16, #tpu.memory_space<vmem>>) attributes {dimension_semantics = [#tpu.dimension_semantics<parallel>], iteration_bounds = array<i64: 1>, scalar_prefetch = 0 : i64, scratch_operands = 0 : i64, tpu.core_type = #tpu.core_type<tc>, window_params = [{transform_indices = @transform_0, window_bounds = array<i64: 8, 32>}, {transform_indices = @transform_1, window_bounds = array<i64: 8, 32>}, {transform_indices = @transform_2, window_bounds = array<i64: 8, 32>}, {transform_indices = @transform_3, window_bounds = array<i64: 8, 32>}]} {
    %c0 = arith.constant 0 : index
    %c0_0 = arith.constant 0 : index
    %0 = vector.load %arg1[%c0, %c0_0] : memref<8x32xf32, #tpu.memory_space<vmem>>, vector<8x32xf32>
    %1 = arith.mulf %0, %0 : vector<8x32xf32>
    %cst = arith.constant dense<0.000000e+00> : vector<8xf32>
    %2 = vector.multi_reduction <add>, %1, %cst [1] : vector<8x32xf32> to vector<8xf32>
    %3 = vector.shape_cast %2 : vector<8xf32> to vector<8x1xf32>
    %4 = math.sqrt %3 : vector<8x1xf32>
    %cst_1 = arith.constant 9.99999996E-13 : f32
    %5 = vector.broadcast %cst_1 : f32 to vector<8x1xf32>
    %6 = arith.maximumf %4, %5 : vector<8x1xf32>
    %7 = vector.broadcast %6 : vector<8x1xf32> to vector<8x32xf32>
    %8 = arith.divf %0, %7 : vector<8x32xf32>
    %9 = arith.truncf %8 : vector<8x32xf32> to vector<8x32xbf16>
    %c0_2 = arith.constant 0 : index
    %c0_3 = arith.constant 0 : index
    %10 = vector.load %arg3[%c0_2, %c0_3] : memref<8x32xbf16, #tpu.memory_space<vmem>>, vector<8x32xbf16>
    tpu.vector_store %arg3[%c0_2, %c0_3], %9 {strides = array<i32>} : memref<8x32xbf16, #tpu.memory_space<vmem>>, vector<8x32xbf16>,
    %c0_4 = arith.constant 0 : index
    %c0_5 = arith.constant 0 : index
    %11 = vector.load %arg2[%c0_4, %c0_5] : memref<8x32xf32, #tpu.memory_space<vmem>>, vector<8x32xf32>
    %12 = arith.mulf %11, %11 : vector<8x32xf32>
    %cst_6 = arith.constant dense<0.000000e+00> : vector<8xf32>
    %13 = vector.multi_reduction <add>, %12, %cst_6 [1] : vector<8x32xf32> to vector<8xf32>
    %14 = vector.shape_cast %13 : vector<8xf32> to vector<8x1xf32>
    %15 = math.sqrt %14 : vector<8x1xf32>
    %cst_7 = arith.constant 9.99999996E-13 : f32
    %16 = vector.broadcast %cst_7 : f32 to vector<8x1xf32>
    %17 = arith.maximumf %15, %16 : vector<8x1xf32>
    %18 = vector.broadcast %17 : vector<8x1xf32> to vector<8x32xf32>
    %19 = arith.divf %11, %18 : vector<8x32xf32>
    %20 = arith.truncf %19 : vector<8x32xf32> to vector<8x32xbf16>
    %c0_8 = arith.constant 0 : index
    %c0_9 = arith.constant 0 : index
    %21 = vector.load %arg4[%c0_8, %c0_9] : memref<8x32xbf16, #tpu.memory_space<vmem>>, vector<8x32xbf16>
    tpu.vector_store %arg4[%c0_8, %c0_9], %20 {strides = array<i32>} : memref<8x32xbf16, #tpu.memory_space<vmem>>, vector<8x32xbf16>,
    return
  }
  func.func @transform_0(%arg0: i32) -> (i32, i32) {
    %c0_i32 = arith.constant 0 : i32
    %c0_i32_0 = arith.constant 0 : i32
    return %arg0, %c0_i32 : i32, i32
  }
  func.func @transform_1(%arg0: i32) -> (i32, i32) {
    %c0_i32 = arith.constant 0 : i32
    %c0_i32_0 = arith.constant 0 : i32
    return %arg0, %c0_i32 : i32, i32
  }
  func.func @transform_2(%arg0: i32) -> (i32, i32) {
    %c0_i32 = arith.constant 0 : i32
    %c0_i32_0 = arith.constant 0 : i32
    return %arg0, %c0_i32 : i32, i32
  }
  func.func @transform_3(%arg0: i32) -> (i32, i32) {
    %c0_i32 = arith.constant 0 : i32
    %c0_i32_0 = arith.constant 0 : i32
    return %arg0, %c0_i32 : i32, i32
  }
}

</mosaic_0001>

<bundles_post_ra>
// kernel: tpu_custom_call.1
= control target key start
LH: loop header
LB: loop body
LE: loop exit
PB: predicated region body
PF: predicated region fallthrough
CT: control target
= control target key end

     0   :  { %9 = vsyncpa [#allocation3], 0  ;;  %s287_s0 = inlined_call_operand.hbm [shape: f32[8,32], index: 0, kind: input, shape index: {}]   ;;  %s288_s1 = inlined_call_operand.hbm [shape: f32[8,32], index: 1, kind: input, shape index: {}]   ;;  %s289_s2 = inlined_call_operand.hbm [shape: bf16[8,32], index: 2, kind: output, shape index: {0}]   ;;  %s290_s3 = inlined_call_operand.hbm [shape: bf16[8,32], index: 3, kind: output, shape index: {1}]  }
   0x1   :  { %10 = vsyncpa [#allocation6], 0 }
   0x2   :  { %11 = vsyncpa [#allocation4], 0 }
   0x3   :  { %12 = vsyncpa [#allocation9], 0  ;;  %s213_s12 = smov [#allocation2]   ;;  %s214_s14 = smov [#allocation5]  }
   0x4   :  { %s19_s13 = sshll.u32 %s213_s12, 4  ;;  %s29_s15 = sshll.u32 %s214_s14, 4  ;;  %s20_s13 = int_to_ptr.vmem [resolvable:$true] %s19_s13  ;;  %s30_s15 = int_to_ptr.vmem [resolvable:$true] %s29_s15 }
   0x5   :  { %s117_s18 = scalar_lea.hbm %s287_s0, 128 }
   0x6   :  { %p118_p0 = scmp.ne.s32.totalorder %s287_s0, %s117_s18  ;;  %p121_p1 = scmp.lt.u32.totalorder %s117_s18, %s287_s0 }
   0x8   :  { %p123_p2 = pnand %p121_p1, %p118_p0 }
   0xa   :  { %126 = shalt.err (!%p123_p2)
}
   0xb   :  { %s127_s23 = scalar_lea.vmem %s20_s13, 128  ;;  %p132_p4 = scmp.lt.s32.totalorder %s20_s13, %s20_s13 }
   0xc   :  { %p128_p3 = scmp.ne.s32.totalorder %s20_s13, %s127_s23  ;;  %p133_p5 = scmp.lt.s32.totalorder %s127_s23, %s127_s23 }
   0xe   :  { %p134_p6 = por %p133_p5, %p132_p4 }
  0x10   :  { %p135_p7 = pnand %p134_p6, %p128_p3 }
  0x12   :  { %138 = shalt.err (!%p135_p7)
}
  0x13   :  { %22 = dma.hbm_to_vmem [thread:$0]  %s287_s0, 128, %s20_s13, [#allocation3]  }
  0x14   :  { %s139_s28 = scalar_lea.hbm %s288_s1, 128 }
  0x15   :  { %p140_p8 = scmp.ne.s32.totalorder %s288_s1, %s139_s28  ;;  %p143_p9 = scmp.lt.u32.totalorder %s139_s28, %s288_s1 }
  0x17   :  { %p145_p10 = pnand %p143_p9, %p140_p8 }
  0x19   :  { %148 = shalt.err (!%p145_p10)
}
  0x1a   :  { %s149_s6 = scalar_lea.vmem %s30_s15, 128  ;;  %p154_p12 = scmp.lt.s32.totalorder %s30_s15, %s30_s15 }
  0x1b   :  { %p150_p11 = scmp.ne.s32.totalorder %s30_s15, %s149_s6  ;;  %p155_p13 = scmp.lt.s32.totalorder %s149_s6, %s149_s6 }
  0x1d   :  { %p156_p0 = por %p155_p13, %p154_p12 }
  0x1f   :  { %p157_p1 = pnand %p156_p0, %p150_p11 }
  0x21   :  { %160 = shalt.err (!%p157_p1)
}
  0x22   :  { %32 = dma.hbm_to_vmem [thread:$0]  %s288_s1, 128, %s30_s15, [#allocation6]  }
  0x23   :  { %205 = dma.done.wait [#allocation3], 128  }
  0x24   :  { %206 = vsyncadd [#allocation3], 4294967168 }
  0x25   :  { %207 = dma.done.wait [#allocation6], 128  }
  0x26   :  { %208 = vsyncadd [#allocation6], 4294967168  ;;  %v39_v0 = vld [vmem:[#allocation2] sm:$0xff]  ;;  %vm41_vm0 = vcmask 261120   ;;  %v58_v1 = vld [vmem:[#allocation5] sm:$0xff]  ;;  %s215_s1 = smov [#allocation7]  }
  0x27   :  { %v40_v2 = vmul.f32 %v39_v0, %v39_v0  ;;  %v59_v3 = vmul.f32 %v58_v1, %v58_v1  ;;  %s81_s8 = sshll.u32 %s215_s1, 4  ;;  %vm56_vm5 = vcmask 257024   ;;  %s216_s9 = smov [#allocation8]   ;;  %s82_s8 = int_to_ptr.vmem [resolvable:$true] %s81_s8 }
  0x28   :  { %s91_s10 = sshll.u32 %s216_s9, 4  ;;  %s161_s11 = scalar_lea.vmem %s82_s8, 64  ;;  %s92_s10 = int_to_ptr.vmem [resolvable:$true] %s91_s10 }
  0x29   :  { %v42_v4 = vsel %vm41_vm0, %v40_v2, 0.0  ;;  %v60_v5 = vsel %vm41_vm0, %v59_v3, 0.0  ;;  %p162_p2 = scmp.ne.s32.totalorder %s82_s8, %s161_s11  ;;  %p166_p3 = scmp.lt.s32.totalorder %s82_s8, %s82_s8 }
  0x2a   :  { %43 = vadd.xlane.f32.xlu0 %v42_v4  ;;  %p167_p4 = scmp.lt.s32.totalorder %s161_s11, %s161_s11 }
  0x2c   :  { %p168_p5 = por %p167_p4, %p166_p3 }
  0x2e   :  { %61 = vadd.xlane.f32.xlu0 %v60_v5  ;;  %p169_p6 = pnand %p168_p5, %p162_p2 }
  0xb7   :  { %v44_v6 = vpop.xlane.xlu0 %43 }
  0xb8   :  { %109 = vrsqrt.f32 %v44_v6  ;;  %vm47_vm1 = vcmp.eq.f32.partialorder %v44_v6, inf  ;;  %v50_v10 = vand.u32 2147483648, %v44_v6  ;;  %vm49_vm2 = vcmp.eq.f32.partialorder %v44_v6, 0.0 }
  0xbb   :  { %v62_v7 = vpop.xlane.xlu0 %61 }
  0xbc   :  { %111 = vrsqrt.f32 %v62_v7  ;;  %vm65_vm3 = vcmp.eq.f32.partialorder %v62_v7, inf  ;;  %v68_v16 = vand.u32 2147483648, %v62_v7  ;;  %vm67_vm4 = vcmp.eq.f32.partialorder %v62_v7, 0.0 }
  0xc2   :  { %v110_v8 = vpop.eup %109 }
  0xc3   :  { %v46_v9 = vmul.f32 %v110_v8, %v44_v6 }
  0xc5   :  { %v48_v11 = vsel %vm47_vm1, %v44_v6, %v46_v9 }
  0xc6   :  { %v112_v12 = vpop.eup %111  ;;  %v51_v13 = vsel %vm49_vm2, %v50_v10, %v48_v11 }
  0xc7   :  { %v52_v14 = vmax.f32 %v51_v13, 1e-12  ;;  %v64_v15 = vmul.f32 %v112_v12, %v62_v7 }
  0xc9   :  { %113 = vrcp.f32 %v52_v14  ;;  %v66_v17 = vsel %vm65_vm3, %v62_v7, %v64_v15 }
  0xca   :  { %v69_v18 = vsel %vm67_vm4, %v68_v16, %v66_v17 }
  0xcb   :  { %v70_v19 = vmax.f32 %v69_v18, 1e-12 }
  0xcd   :  { %115 = vrcp.f32 %v70_v19 }
  0xd3   :  { %v114_v20 = vpop.eup %113 }
  0xd4   :  { %v54_v21 = vmul.f32 %v114_v20, %v39_v0 }
  0xd6   :  { %v55_v22 = vpack.c.bf16 %v54_v21, %v54_v21 }
  0xd7   :  { %v116_v23 = vpop.eup %115 }
  0xd8   :  { %57 = vst.msk [vmem:[#allocation7] sm:$0xf] %vm56_vm5, %v55_v22  ;;  %v72_v24 = vmul.f32 %v116_v23, %v58_v1 }
  0xd9   :  { %172 = shalt.err (!%p169_p6)
}
  0xda   :  { %s173_s14 = scalar_lea.hbm %s289_s2, 64 }
  0xdb   :  { %p174_p7 = scmp.ne.s32.totalorder %s289_s2, %s173_s14  ;;  %p177_p8 = scmp.lt.u32.totalorder %s173_s14, %s289_s2 }
  0xdd   :  { %p179_p9 = pnand %p177_p8, %p174_p7 }
  0xdf   :  { %182 = shalt.err (!%p179_p9)
}
  0xe0   :  { %84 = dma.vmem_to_hbm [thread:$0]  %s82_s8, 64, %s289_s2, [#allocation4]   ;;  %v73_v25 = vpack.c.bf16 %v72_v24, %v72_v24 }
  0xe1   :  { %s183_s21 = scalar_lea.vmem %s92_s10, 64  ;;  %p188_p11 = scmp.lt.s32.totalorder %s92_s10, %s92_s10 }
  0xe2   :  { %74 = vst.msk [vmem:[#allocation8] sm:$0xf] %vm56_vm5, %v73_v25  ;;  %p184_p10 = scmp.ne.s32.totalorder %s92_s10, %s183_s21  ;;  %p189_p12 = scmp.lt.s32.totalorder %s183_s21, %s183_s21 }
  0xe4   :  { %p190_p13 = por %p189_p12, %p188_p11 }
  0xe6   :  { %p191_p0 = pnand %p190_p13, %p184_p10 }
  0xe8   :  { %194 = shalt.err (!%p191_p0)
}
  0xe9   :  { %s195_s24 = scalar_lea.hbm %s290_s3, 64 }
  0xea   :  { %p196_p1 = scmp.ne.s32.totalorder %s290_s3, %s195_s24  ;;  %p199_p2 = scmp.lt.u32.totalorder %s195_s24, %s290_s3 }
  0xec   :  { %p201_p3 = pnand %p199_p2, %p196_p1 }
  0xee   :  { %204 = shalt.err (!%p201_p3)
}
  0xef   :  { %94 = dma.vmem_to_hbm [thread:$0]  %s92_s10, 64, %s290_s3, [#allocation9]  }
  0xf0   :  { %209 = dma.done.wait [#allocation4], 64  }
  0xf1   :  { %210 = vsyncadd [#allocation4], 4294967232 }
  0xf2   :  { %211 = dma.done.wait [#allocation9], 64  }
  0xf3   :  { %212 = vsyncadd [#allocation9], 4294967232 }
  0xf4   :  { %101 = vsyncpa [#allocation3], 1 }
  0xf5   :  { %102 = vsyncpa [#allocation6], 1 }
  0xf6   :  { %103 = vsyncpa [#allocation4], 1 }
  0xf7   :  { %104 = vsyncpa [#allocation9], 1 }

</bundles_post_ra>
